<compile_context>
chip_gen: v7x
topology: tpu7x:2x2x1
jax: 0.10.0
libtpu: 0.0.40
codegen_flags: <defaults>
</compile_context>

<pallas_src>
import jax
import jax.numpy as jnp
from jax.experimental import pallas as pl
from jax.experimental.pallas import tpu as pltpu


def mlp_kernel(x_ref, w1_ref, b1_ref, w2_ref, b2_ref, o_ref):
    # x_ref:  [TILE_B, 5]   f32
    # w1_ref: [5, 128]      f32    b1_ref: [1, 128] f32
    # w2_ref: [128, 12]     f32    b2_ref: [1, 12]  f32
    # o_ref:  [TILE_B, 12]  f32
    h = jnp.dot(x_ref[...], w1_ref[...], preferred_element_type=jnp.float32)
    h = jnp.maximum(h + b1_ref[...], 0.0)                      # bias + ReLU in f32
    o = jnp.dot(h, w2_ref[...], preferred_element_type=jnp.float32) + b2_ref[...]
    o_ref[...] = o.astype(o_ref.dtype)


def _round_up(v, m):
    return ((v + m - 1) // m) * m


def simple_mlp_forward(x, w1, b1, w2, b2, *, tile_b=4096):
    """x: [B, 5] f32; w1: [5,128]; b1: [128]; w2: [128,12]; b2: [12] -> [B,12] f32."""
    B, K = x.shape
    H = w1.shape[1]   # 128
    N = w2.shape[1]   # 12

    # Batch tile: multiple of 8 (sublane), no larger than needed for small batches,
    # capped at tile_b (VMEM budget). For big batches keep >= 2 grid steps so the
    # "parallel" batch axis can be split across the 2 TensorCores on v7x.
    tb = min(_round_up(B, 8), _round_up(tile_b, 8))
    if B >= 2048 and pl.cdiv(B, tb) < 2:
        tb = _round_up(pl.cdiv(B, 2), 8)
    num_tiles = pl.cdiv(B, tb)

    b1_2d = b1.reshape(1, H).astype(jnp.float32)
    b2_2d = b2.reshape(1, N).astype(jnp.float32)

    flops = 2 * B * (K * H + H * N)
    bytes_accessed = 4 * (B * (K + N) + K * H + H + H * N + N)
    cost = pl.CostEstimate(flops=flops, transcendentals=0,
                           bytes_accessed=bytes_accessed)

    return pl.pallas_call(
        mlp_kernel,
        out_shape=jax.ShapeDtypeStruct((B, N), jnp.float32),
        grid_spec=pltpu.PrefetchScalarGridSpec(
            num_scalar_prefetch=0,
            grid=(num_tiles,),
            in_specs=[
                pl.BlockSpec((tb, K), lambda i: (i, 0)),   # x: tiled over batch
                pl.BlockSpec((K, H), lambda i: (0, 0)),    # w1: VMEM-resident
                pl.BlockSpec((1, H), lambda i: (0, 0)),    # b1
                pl.BlockSpec((H, N), lambda i: (0, 0)),    # w2
                pl.BlockSpec((1, N), lambda i: (0, 0)),    # b2
            ],
            out_specs=pl.BlockSpec((tb, N), lambda i: (i, 0)),
        ),
        compiler_params=pltpu.CompilerParams(
            dimension_semantics=("parallel",),
            vmem_limit_bytes=32 * 1024 * 1024,
        ),
        cost_estimate=cost,
    )(x.astype(jnp.float32), w1.astype(jnp.float32), b1_2d,
      w2.astype(jnp.float32), b2_2d)


def init_params(key):
    """Deterministic init mirroring torch.nn.Linear default (uniform +/- 1/sqrt(fan_in)).

    PyTorch Linear weight is [out, in]; we store the transpose [in, out] for the kernel.
    """
    k1, k2, k3, k4 = jax.random.split(key, 4)
    bound1 = 1.0 / jnp.sqrt(5.0)
    bound2 = 1.0 / jnp.sqrt(128.0)
    w1 = jax.random.uniform(k1, (5, 128), jnp.float32, -bound1, bound1)
    b1 = jax.random.uniform(k2, (128,), jnp.float32, -bound1, bound1)
    w2 = jax.random.uniform(k3, (128, 12), jnp.float32, -bound2, bound2)
    b2 = jax.random.uniform(k4, (12,), jnp.float32, -bound2, bound2)
    return w1, b1, w2, b2


if __name__ == "__main__":
    key = jax.random.PRNGKey(0)
    kx, kx2, kp = jax.random.split(key, 3)
    w1, b1, w2, b2 = init_params(kp)

    def ref_fn(x):
        return jnp.maximum(x @ w1 + b1, 0.0) @ w2 + b2

    # Tolerances are loose enough to absorb MXU f32-vs-bf16-pass differences between
    # the kernel and the XLA reference, tight enough to catch real bugs.
    ATOL = RTOL = 1e-2

    # 1) Small ragged batch, multi-tile path (50 rows, 16-row tiles, last tile ragged).
    x_small = jax.random.normal(kx, (50, 5), jnp.float32)
    out = jax.block_until_ready(simple_mlp_forward(x_small, w1, b1, w2, b2, tile_b=16))
    ref = ref_fn(x_small)
    assert out.shape == (50, 12)
    assert jnp.allclose(out, ref, atol=ATOL, rtol=RTOL), (
        float(jnp.max(jnp.abs(out - ref))))

    # 2) Default tile size, single (ragged) grid step.
    out2 = jax.block_until_ready(simple_mlp_forward(x_small, w1, b1, w2, b2))
    assert jnp.allclose(out2, ref, atol=ATOL, rtol=RTOL), (
        float(jnp.max(jnp.abs(out2 - ref))))

    # 3) Large batch exercising the default 4096-row tiles (2 parallel grid steps).
    x_big = jax.random.normal(kx2, (8192, 5), jnp.float32)
    out3 = jax.block_until_ready(simple_mlp_forward(x_big, w1, b1, w2, b2))
    ref_big = ref_fn(x_big)
    assert out3.shape == (8192, 12)
    assert jnp.allclose(out3, ref_big, atol=ATOL, rtol=RTOL), (
        float(jnp.max(jnp.abs(out3 - ref_big))))

    print("KERNEL_OK")
</pallas_src>

<mosaic_0001>
module attributes {stable_mosaic.version = 11 : i64} {
  func.func @mlp_kernel(%arg0: i32, %arg1: memref<16x5xf32, #tpu.memory_space<vmem>>, %arg2: memref<5x128xf32, #tpu.memory_space<vmem>>, %arg3: memref<1x128xf32, #tpu.memory_space<vmem>>, %arg4: memref<128x12xf32, #tpu.memory_space<vmem>>, %arg5: memref<1x12xf32, #tpu.memory_space<vmem>>, %arg6: memref<16x12xf32, #tpu.memory_space<vmem>>) attributes {dimension_semantics = [#tpu.dimension_semantics<parallel>], iteration_bounds = array<i64: 4>, scalar_prefetch = 0 : i64, scratch_operands = 0 : i64, tpu.core_type = #tpu.core_type<tc>, window_params = [{transform_indices = @transform_0, window_bounds = array<i64: 16, 5>}, {pipeline_mode = #tpu.pipeline_mode<synchronous>, transform_indices = @transform_1, window_bounds = array<i64: 5, 128>}, {pipeline_mode = #tpu.pipeline_mode<synchronous>, transform_indices = @transform_2, window_bounds = array<i64: 1, 128>}, {pipeline_mode = #tpu.pipeline_mode<synchronous>, transform_indices = @transform_3, window_bounds = array<i64: 128, 12>}, {pipeline_mode = #tpu.pipeline_mode<synchronous>, transform_indices = @transform_4, window_bounds = array<i64: 1, 12>}, {transform_indices = @transform_5, window_bounds = array<i64: 16, 12>}]} {
    %c0 = arith.constant 0 : index
    %c0_0 = arith.constant 0 : index
    %0 = vector.load %arg1[%c0, %c0_0] : memref<16x5xf32, #tpu.memory_space<vmem>>, vector<16x5xf32>
    %c0_1 = arith.constant 0 : index
    %c0_2 = arith.constant 0 : index
    %1 = vector.load %arg2[%c0_1, %c0_2] : memref<5x128xf32, #tpu.memory_space<vmem>>, vector<5x128xf32>
    %cst = arith.constant dense<0.000000e+00> : vector<16x128xf32>
    %2 = tpu.matmul %0, %1, %cst {dimension_numbers = #tpu.dot_dimension_numbers<[1], [0], [0], [1], [0, 0, 1, 1], [], []>} : vector<16x5xf32>, vector<5x128xf32>, vector<16x128xf32> -> vector<16x128xf32>
    %c0_3 = arith.constant 0 : index
    %c0_4 = arith.constant 0 : index
    %3 = vector.load %arg3[%c0_3, %c0_4] : memref<1x128xf32, #tpu.memory_space<vmem>>, vector<1x128xf32>
    %4 = vector.broadcast %3 : vector<1x128xf32> to vector<16x128xf32>
    %5 = arith.addf %2, %4 : vector<16x128xf32>
    %cst_5 = arith.constant 0.000000e+00 : f32
    %6 = vector.broadcast %cst_5 : f32 to vector<16x128xf32>
    %7 = arith.maximumf %5, %6 : vector<16x128xf32>
    %c0_6 = arith.constant 0 : index
    %c0_7 = arith.constant 0 : index
    %8 = vector.load %arg4[%c0_6, %c0_7] : memref<128x12xf32, #tpu.memory_space<vmem>>, vector<128x12xf32>
    %cst_8 = arith.constant dense<0.000000e+00> : vector<16x12xf32>
    %9 = tpu.matmul %7, %8, %cst_8 {dimension_numbers = #tpu.dot_dimension_numbers<[1], [0], [0], [1], [0, 0, 1, 1], [], []>} : vector<16x128xf32>, vector<128x12xf32>, vector<16x12xf32> -> vector<16x12xf32>
    %c0_9 = arith.constant 0 : index
    %c0_10 = arith.constant 0 : index
    %10 = vector.load %arg5[%c0_9, %c0_10] : memref<1x12xf32, #tpu.memory_space<vmem>>, vector<1x12xf32>
    %11 = vector.broadcast %10 : vector<1x12xf32> to vector<16x12xf32>
    %12 = arith.addf %9, %11 : vector<16x12xf32>
    %c0_11 = arith.constant 0 : index
    %c0_12 = arith.constant 0 : index
    %13 = vector.load %arg6[%c0_11, %c0_12] : memref<16x12xf32, #tpu.memory_space<vmem>>, vector<16x12xf32>
    tpu.vector_store %arg6[%c0_11, %c0_12], %12 {strides = array<i32>} : memref<16x12xf32, #tpu.memory_space<vmem>>, vector<16x12xf32>,
    return
  }
  func.func @transform_0(%arg0: i32) -> (i32, i32) {
    %c0_i32 = arith.constant 0 : i32
    %c0_i32_0 = arith.constant 0 : i32
    return %arg0, %c0_i32 : i32, i32
  }
  func.func @transform_1(%arg0: i32) -> (i32, i32) {
    %c0_i32 = arith.constant 0 : i32
    %c0_i32_0 = arith.constant 0 : i32
    %c0_i32_1 = arith.constant 0 : i32
    return %c0_i32, %c0_i32_0 : i32, i32
  }
  func.func @transform_2(%arg0: i32) -> (i32, i32) {
    %c0_i32 = arith.constant 0 : i32
    %c0_i32_0 = arith.constant 0 : i32
    %c0_i32_1 = arith.constant 0 : i32
    return %c0_i32, %c0_i32_0 : i32, i32
  }
  func.func @transform_3(%arg0: i32) -> (i32, i32) {
    %c0_i32 = arith.constant 0 : i32
    %c0_i32_0 = arith.constant 0 : i32
    %c0_i32_1 = arith.constant 0 : i32
    return %c0_i32, %c0_i32_0 : i32, i32
  }
  func.func @transform_4(%arg0: i32) -> (i32, i32) {
    %c0_i32 = arith.constant 0 : i32
    %c0_i32_0 = arith.constant 0 : i32
    %c0_i32_1 = arith.constant 0 : i32
    return %c0_i32, %c0_i32_0 : i32, i32
  }
  func.func @transform_5(%arg0: i32) -> (i32, i32) {
    %c0_i32 = arith.constant 0 : i32
    %c0_i32_0 = arith.constant 0 : i32
    return %arg0, %c0_i32 : i32, i32
  }
}

</mosaic_0001>

<bundles_post_ra>
// kernel: tpu_custom_call.1
= control target key start
LH: loop header
LB: loop body
LE: loop exit
PB: predicated region body
PF: predicated region fallthrough
CT: control target
= control target key end

     0   :  { %s995_s18 = smov 0   ;;  %s997_s19 = smov 0   ;;  %s1135_s0 = inlined_call_operand.vmem [shape: f32[50,5], index: 0, kind: input, shape index: {}]   ;;  %s1136_s1 = inlined_call_operand.vmem [shape: f32[5,128], index: 1, kind: input, shape index: {}]   ;;  %s1137_s2 = inlined_call_operand.vmem [shape: f32[1,128], index: 2, kind: input, shape index: {}]   ;;  %s1138_s3 = inlined_call_operand.vmem [shape: f32[128,12], index: 3, kind: input, shape index: {}]   ;;  %s1139_s4 = inlined_call_operand.vmem [shape: f32[1,12], index: 4, kind: input, shape index: {}]   ;;  %s1140_s5 = inlined_call_operand.vmem [shape: f32[50,12], index: 5, kind: output, shape index: {}]  }
   0x1   :  { %s999_s20 = smov 0  }
   0x2 LB: > { %s1008_s21 = sadd.s32 4294967295, %s931_s20   ;;  %s1010_s22 = sadd.s32 1, %s931_s20   ;;  %s931_s20 = sphi %s999_s20, %s1144_s20   ;;  %s927_s19 = sphi %s997_s19, %s1143_s19   ;;  %s923_s18 = sphi %s995_s18, %s1142_s18  }
   0x3   : > { %s129_s23 = ssub.s32 %s931_s20, %s1010_s22  ;;  %s132_s24 = sadd.s32 1, %s927_s19 }
   0x4   : > { %p130_p0 = scmp.eq.s32.totalorder %s129_s23, 0  ;;  %p142_p1 = scmp.ne.s32.totalorder %s927_s19, %s923_s18 }
   0x5   : > { %p143_p2 = scmp.eq.s32.totalorder %s1008_s21, 3  ;;  %p667_p3 = scmp.ge.s32.totalorder %s931_s20, 1 }
   0x6   : > { %s1018_s25 = scalar_select %p130_p0, %s927_s19, %s132_s24  }
   0x7   : > { %p1020_p4 = por %p143_p2, %p142_p1  ;;  %p196_p5 = scmp.lt.s32.totalorder %s931_s20, 5 }
   0x9   : > { %p197_p6 = pnand %p667_p3, %p196_p5 }
   0xa   : > { %v248_v0 = vld [vmem:[%s1136_s1] sm:$0x1f] (!%p197_p6)  ;;  %vm263_vm0 = vcmask (!%p197_p6), 1044480   ;;  %s1028_s29 = sshll.u32 (!%p197_p6), %s1008_s21, 1  ;;  %v345_v2 = vld [vmem:[%s1138_s3 + $0x8] sm:$0xff] (!%p197_p6)  ;;  %v346_v3 = vld [vmem:[%s1138_s3 + $0x10] sm:$0xff] (!%p197_p6) }
   0xb   : > { %200 = sbr.rel (%p197_p6) target bundleno = 507 (0x1fb), region = 40  ;;  %v344_v1 = vld [vmem:[%s1138_s3] sm:$0xff] (!%p197_p6)  ;;  %717 = vmatprep.subr.msk.mxu0 (!%p197_p6), %vm263_vm0, %v248_v0  ;;  %p232_p7 = scmp.lt.s32.totalorder (!%p197_p6), %s1028_s29, 6  ;;  %v347_v4 = vld [vmem:[%s1138_s3 + $0x18] sm:$0xff] (!%p197_p6)  ;;  %v349_v8 = vld [vmem:[%s1138_s3 + $0x28] sm:$0xff] (!%p197_p6)  ;;  %vm256_vm1 = vcmask (!%p197_p6), 39936  }
   0xc   : > { %718 = vmatpush3.msk.msra.mxu0 (!%p197_p6), %vm263_vm0, %v248_v0  ;;  %v757_v5 = vpack.c.bf16 (!%p197_p6), %v345_v2, %v344_v1  ;;  %v761_v6 = vpack.c.bf16 (!%p197_p6), %v347_v4, %v346_v3  ;;  %v348_v7 = vld [vmem:[%s1138_s3 + $0x20] sm:$0xff] (!%p197_p6)  ;;  %v350_v10 = vld [vmem:[%s1138_s3 + $0x30] sm:$0xff] (!%p197_p6)  ;;  %v351_v13 = vld [vmem:[%s1138_s3 + $0x38] sm:$0xff] (!%p197_p6)  ;;  %s224_s8 = sand.u32 (!%p197_p6), 1, %s923_s18   ;;  %vm442_vm2 = vcmask (!%p197_p6), 97280  }
   0xd   : > { %v765_v9 = vpack.c.bf16 (!%p197_p6), %v349_v8, %v348_v7  ;;  %v769_v14 = vpack.c.bf16 (!%p197_p6), %v351_v13, %v350_v10  ;;  %v352_v15 = vld [vmem:[%s1138_s3 + $0x40] sm:$0xff] (!%p197_p6)  ;;  %v353_v16 = vld [vmem:[%s1138_s3 + $0x48] sm:$0xff] (!%p197_p6)  ;;  %v354_v18 = vld [vmem:[%s1138_s3 + $0x50] sm:$0xff] (!%p197_p6)  ;;  %s668_s9 = sshll.u32 (!%p197_p6), %s224_s8, 4 }
   0xe   : > { %758 = vmatprep.subr.bf16.mxu1 (!%p197_p6), %v757_v5  ;;  %v773_v17 = vpack.c.bf16 (!%p197_p6), %v353_v16, %v352_v15  ;;  %v355_v19 = vld [vmem:[%s1138_s3 + $0x58] sm:$0xff] (!%p197_p6)  ;;  %v356_v21 = vld [vmem:[%s1138_s3 + $0x60] sm:$0xff] (!%p197_p6)  ;;  %v357_v22 = vld [vmem:[%s1138_s3 + $0x68] sm:$0xff] (!%p197_p6)  ;;  %s1090_s12 = scalar_lea.vmem (!%p197_p6), [#allocation2], %s668_s9  }
   0xf   : > { %760 = vmatpush3.bf16.msra.mxu1 (!%p197_p6), %v757_v5  ;;  %v777_v20 = vpack.c.bf16 (!%p197_p6), %v355_v19, %v354_v18  ;;  %v781_v23 = vpack.c.bf16 (!%p197_p6), %v357_v22, %v356_v21  ;;  %v358_v24 = vld [vmem:[%s1138_s3 + $0x70] sm:$0xff] (!%p197_p6)  ;;  %v359_v25 = vld [vmem:[%s1138_s3 + $0x78] sm:$0xff] (!%p197_p6)  ;;  %v671_v27 = vld [vmem:[%s1137_s2] ss:$0 sm:$0xff] (!%p197_p6) }
  0x10   : > { %762 = vmatprep.subr.bf16.mxu1 (!%p197_p6), %v761_v6  ;;  %v785_v26 = vpack.c.bf16 (!%p197_p6), %v359_v25, %v358_v24  ;;  %v675_v34 = vld [vmem:[%s1139_s4] ss:$0 sm:$0xff] (!%p197_p6) }
  0x12   : > { %s233_s13 = scalar_select %p232_p7, %s1028_s29, 6 }
  0x13   : > { %764 = vmatpush3.bf16.msra.mxu1 %v761_v6  ;;  %s453_s18 = ssub.s32 (%p1020_p4), 7, %s1028_s29 }
  0x14   : > { %s670_s20 = sshll.u32 %s233_s13, 3  ;;  %766 = vmatprep.subr.bf16.mxu1 %v765_v9  ;;  %s693_s13 = sshll.u32 (%p1020_p4), %s1008_s21, 4 }
  0x15   : > { %s235_s27 = scalar_lea.vmem %s1135_s0, %s670_s20  ;;  %p454_p8 = scmp.lt.s32.totalorder (%p1020_p4), %s453_s18, 2 }
  0x16   : > { %v246_v11 = vld [vmem:[%s235_s27] sm:$0xff]  ;;  %v247_v12 = vld [vmem:[%s235_s27 + $0x8] sm:$0xff]  ;;  %s1101_s16 = scalar_lea.vmem (%p1020_p4), %s1140_s5, %s693_s13  }
  0x17   : > { %719 = vmatprep.mubr.msk.f32.mxu0 %vm256_vm1, %v246_v11  ;;  %768 = vmatpush3.bf16.msra.mxu1 %v765_v9 }
  0x18   : > { %720 = vmatmul.mubr.msk.f32.vlgmr.msra.gmra.mrb[0].mxu0 %vm256_vm1, %v247_v12  ;;  %770 = vmatprep.subr.bf16.mxu1 %v769_v14 }
  0x1b   : > { %772 = vmatpush3.bf16.msra.mxu1 %v769_v14 }
  0x1c   : > { %774 = vmatprep.subr.bf16.mxu1 %v773_v17 }
  0x1f   : > { %776 = vmatpush3.bf16.msra.mxu1 %v773_v17 }
  0x20   : > { %778 = vmatprep.subr.bf16.mxu1 %v777_v20 }
  0x23   : > { %780 = vmatpush3.bf16.msra.mxu1 %v777_v20 }
  0x24   : > { %782 = vmatprep.subr.bf16.mxu1 %v781_v23 }
  0x27   : > { %784 = vmatpush3.bf16.msra.mxu1 %v781_v23 }
  0x28   : > { %786 = vmatprep.subr.bf16.mxu1 %v785_v26 }
  0x2b   : > { %788 = vmatpush3.bf16.msra.mxu1 %v785_v26 }
  0xeb   : > { %v721_v28 = vpop.f32.mrb[0].mxu0 }
  0xec   : > { %v339_v29 = vadd.f32 %v721_v28, %v671_v27  ;;  %v333_v30 = vpop.f32.mrb[1].mxu0 }
  0xed   : > { %v334_v31 = vadd.f32 %v671_v27, %v333_v30 }
  0xee   : > { %v343_v33 = vmax.f32 %v339_v29, 0.0 }
  0xef   : > { %v342_v32 = vmax.f32 %v334_v31, 0.0 }
  0xf1   : > { %754 = vmatprep.mubr.f32.mxu1 %v342_v32 }
  0xf2   : > { %755 = vmatmul.mubr.f32.vlgmr.msra.gmra.mrb[0].mxu1 %v343_v33 }
 0x1c3   : > { %451 = sbr.rel (!%p1020_p4) target bundleno = 507 (0x1fb), region = 44 }
 0x1c5   : > { %v756_v35 = vpop.f32.mrb[0].mxu1 }
 0x1c6   : > { %v439_v36 = vadd.f32 %v756_v35, %v675_v34  ;;  %v433_v37 = vpop.f32.mrb[1].mxu1 }
 0x1c7   : > { %v434_v38 = vadd.f32 %v675_v34, %v433_v37 }
 0x1c8   : > { %444 = vst.msk [vmem:[%s1090_s12 + $0x8] sm:$0xff] %vm442_vm2, %v439_v36 }
 0x1c9   : > { %443 = vst.msk [vmem:[%s1090_s12] sm:$0xff] %vm442_vm2, %v434_v38 }
 0x1ca   : > { %s1146_s18 = smov (!%p454_p8, %s453_s18), 2 }
 0x1cb   : > { %s678_s17 = sshll.u32 %s1146_s18, 7 }
 0x1cc   : > { %p681_p9 = scmp.eq.s32.totalorder %s678_s17, 0 }
 0x1cd   : > { %s1107_s20 = sshrl.u32 (!%p681_p9), %s1146_s18, 1 }
 0x1ce   : > { %462 = sbr.rel (%p681_p9) target bundleno = 507 (0x1fb), region = 48  ;;  %p682_p10 = scmp.le.s32.totalorder (!%p681_p9), %s1107_s20, 0 }
 0x1d5   : > { %620 = sbr.rel (%p682_p10) target bundleno = 486 (0x1e6), region = 124  ;;  %s933_s21 = smov (!%p682_p10), %s1101_s16  }
 0x1d6   : > { %s937_s26 = smov (!%p682_p10), %s1090_s12   ;;  %s941_s29 = smov (!%p682_p10), 0  }
 0x1d7   : > { %s945_s23 = smov (!%p682_p10), 0  }
 0x1dc LB: >> { %v526_v39 = vld [vmem:[%s939_s26] sm:$0xff]  ;;  %v528_v40 = vld [vmem:[%s939_s26 + $0x8] sm:$0xff]  ;;  %s530_s24 = sadd.s32 1, %s943_s29  ;;  %s520_s23 = sadd.s32 1, %s947_s23   ;;  %s947_s23 = sphi %s945_s23, %s520_s23   ;;  %s943_s29 = sphi %s941_s29, %s942_s29   ;;  %s939_s26 = sphi %s937_s26, %s535_s26   ;;  %s935_s21 = sphi %s933_s21, %s536_s21  }
 0x1dd   : >> { %527 = vst [vmem:[%s935_s21] sm:$0xff] %v526_v39  ;;  %529 = vst [vmem:[%s935_s21 + $0x8] sm:$0xff] %v528_v40  ;;  %p531_p11 = scmp.ge.s32.totalorder %s530_s24, %s1107_s20  ;;  %p519_p12 = scmp.ge.s32.totalorder %s520_s23, %s1107_s20 }
 0x1df   : >> { %s1148_s24 = smov (%p531_p11, %s530_s24), 0  ;;  %522 = sbr.rel (!%p519_p12) target bundleno = 476 (0x1dc), region = 130 }
 0x1e0   : >> { %s683_s27 = sshll.u32 %s1148_s24, 4  ;;  %s942_s29 = smov %s1148_s24  }
 0x1e1   : >> { %s535_s26 = scalar_lea.vmem %s1090_s12, %s683_s27 [#allocation2]   ;;  %s536_s21 = scalar_lea.vmem %s1101_s16, %s683_s27  }
 0x1e6 PF: > { %s1117_s28 = sand.u32 1, %s1146_s18   ;;  %s694_s30 = sshll.u32 %s1107_s20, 4 }
 0x1e7   : > { %s541_s6 = scalar_lea.vmem %s1090_s12, %s694_s30 [#allocation2]   ;;  %s543_s7 = scalar_lea.vmem %s1101_s16, %s694_s30  }
 0x1e8   : > { %p688_p13 = scmp.le.s32.totalorder %s1117_s28, 0 }
 0x1e9   : > { %s949_s8 = smov (!%p688_p13), %s543_s7   ;;  %s953_s9 = smov (!%p688_p13), %s541_s6  }
 0x1ea   : > { %634 = sbr.rel (%p688_p13) target bundleno = 507 (0x1fb), region = 135  ;;  %s957_s10 = smov (!%p688_p13), 0  }
 0x1eb   : > { %s961_s11 = smov (!%p688_p13), 0  }
 0x1f1 LB: >> { %v553_v41 = vld [vmem:[%s955_s9] sm:$0xff]  ;;  %s555_s18 = sadd.s32 1, %s959_s10  ;;  %s547_s11 = sadd.s32 1, %s963_s11   ;;  %s963_s11 = sphi %s961_s11, %s547_s11   ;;  %s959_s10 = sphi %s957_s10, %s958_s10   ;;  %s955_s9 = sphi %s953_s9, %s560_s9   ;;  %s951_s8 = sphi %s949_s8, %s561_s8  }
 0x1f2   : >> { %554 = vst [vmem:[%s951_s8] sm:$0xff] %v553_v41  ;;  %p556_p0 = scmp.ge.s32.totalorder %s555_s18, %s1117_s28  ;;  %p546_p1 = scmp.ge.s32.totalorder %s547_s11, %s1117_s28 }
 0x1f4   : >> { %s1150_s18 = smov (%p556_p0, %s555_s18), 0  ;;  %549 = sbr.rel (!%p546_p1) target bundleno = 497 (0x1f1), region = 141 }
 0x1f5   : >> { %s689_s12 = sshll.u32 %s1150_s18, 3  ;;  %s958_s10 = smov %s1150_s18  }
 0x1f6   : >> { %s560_s9 = scalar_lea.vmem %s541_s6, %s689_s12 [#allocation2]   ;;  %s561_s8 = scalar_lea.vmem %s543_s7, %s689_s12  }
 0x1fb PF: > { %p12_p2 = scmp.ge.s32.totalorder %s1010_s22, 6   ;;  %s1142_s18 = smov %s927_s19 }
 0x1fc   : > { %s1143_s19 = smov %s1018_s25  ;;  %s1144_s20 = smov %s1010_s22 }
 0x1fd   :  { %14 = sbr.rel (!%p12_p2) target bundleno = 2 (0x2), region = 152 }

</bundles_post_ra>
